<compile_context>
chip_gen: v5e
topology: v5e:2x2
jax: 0.10.0
libtpu: 0.0.40
codegen_flags: <defaults>
</compile_context>

<pallas_src>
import functools
import math

import jax
import jax.numpy as jnp
import numpy as np
from jax.experimental import pallas as pl
from jax.experimental.pallas import tpu as pltpu

_VMEM_LIMIT = 32 * 1024 * 1024   # safe on v5e/v6e (128 MiB) and v7x (64 MiB per TC)


# ----------------------------- Kernel A: Linear + ReLU ------------------------
def _linear_relu_kernel(x_ref, w_ref, b_ref, o_ref):
    # x: (bm, C_in), w: (C_in, C_out), b: (1, C_out)
    x = x_ref[...].astype(jnp.bfloat16)
    w = w_ref[...].astype(jnp.bfloat16)
    y = jnp.dot(x, w, preferred_element_type=jnp.float32) + b_ref[...]
    o_ref[...] = jnp.maximum(y, 0.0).astype(o_ref.dtype)


def linear_relu(x2d, w, b, *, out_dtype=jnp.bfloat16, block_m=512):
    M, C_in = x2d.shape
    C_out = w.shape[1]
    bm = M if M <= block_m else block_m
    grid = (pl.cdiv(M, bm),)
    return pl.pallas_call(
        _linear_relu_kernel,
        out_shape=jax.ShapeDtypeStruct((M, C_out), out_dtype),
        grid=grid,
        in_specs=[
            pl.BlockSpec((bm, C_in), lambda i: (i, 0)),
            pl.BlockSpec((C_in, C_out), lambda i: (0, 0)),
            pl.BlockSpec((1, C_out), lambda i: (0, 0)),
        ],
        out_specs=pl.BlockSpec((bm, C_out), lambda i: (i, 0)),
        compiler_params=pltpu.CompilerParams(
            dimension_semantics=("parallel",),
            vmem_limit_bytes=_VMEM_LIMIT),
    )(x2d, w, b.reshape(1, C_out))


# ---------- Kernel B: fused multi-head attention + residual + layernorm -------
def _mha_fused_kernel(q_ref, k_ref, v_ref, kmask_ref, qmask_ref, res_ref,
                      gamma_ref, beta_ref, o_ref, m_sc, l_sc, acc_sc,
                      *, num_heads, causality, epsilon, seq_k):
    H = num_heads
    bq, C = q_ref.shape[1], q_ref.shape[2]
    bk = k_ref.shape[1]
    d = C // H
    qi = pl.program_id(1)
    kv = pl.program_id(2)

    @pl.when(kv == 0)
    def _():
        m_sc[...] = jnp.full_like(m_sc, -jnp.inf)
        l_sc[...] = jnp.zeros_like(l_sc)
        acc_sc[...] = jnp.zeros_like(acc_sc)

    def _compute():
        # Q already carries 1/sqrt(d) (folded into the projection) and is bf16.
        q = q_ref[0].astype(jnp.bfloat16)     # (bq, C)
        k = k_ref[0].astype(jnp.bfloat16)     # (bk, C)
        v = v_ref[0].astype(jnp.bfloat16)     # (bk, C)

        neg = jnp.float32(-2.0 ** 32 + 1)

        # Masks depend only on the (q,k) tile, not the head: build once per grid step.
        masked = jnp.broadcast_to(kmask_ref[0] == 0.0, (bq, bk))   # key padding
        needs_col = causality or (seq_k % bk != 0)
        if needs_col:
            col = jax.lax.broadcasted_iota(jnp.int32, (bq, bk), 1) + kv * bk
        if causality:
            row = jax.lax.broadcasted_iota(jnp.int32, (bq, bk), 0) + qi * bq
            masked = jnp.logical_or(masked, col > row)
        if seq_k % bk != 0:                                        # partial last k tile
            masked = jnp.logical_or(masked, col >= seq_k)

        # One whole-scratch load per k step; per-head math stays in registers.
        m_all = m_sc[...]       # (bq, H)
        l_all = l_sc[...]       # (bq, H)
        acc_all = acc_sc[...]   # (bq, C)

        dn = (((1,), (1,)), ((), ()))          # contract last dims (Q K^T), no batch
        new_m, new_l, new_acc = [], [], []
        for h in range(H):                     # static unroll, H is small
            sl = slice(h * d, (h + 1) * d)
            s = jax.lax.dot_general(q[:, sl], k[:, sl], dn,
                                    preferred_element_type=jnp.float32)  # (bq, bk)
            s = jnp.where(masked, neg, s)

            m_prev = m_all[:, h:h + 1]                               # (bq, 1)
            m_new = jnp.maximum(m_prev, jnp.max(s, axis=-1, keepdims=True))
            alpha = jnp.exp(m_prev - m_new)
            p = jnp.exp(s - m_new)                                   # (bq, bk)
            new_l.append(alpha * l_all[:, h:h + 1] + jnp.sum(p, axis=-1, keepdims=True))
            new_acc.append(alpha * acc_all[:, sl] + jnp.dot(
                p.astype(jnp.bfloat16), v[:, sl], preferred_element_type=jnp.float32))
            new_m.append(m_new)

        # Single concatenated store per k step.
        m_sc[...] = jnp.concatenate(new_m, axis=1)
        l_sc[...] = jnp.concatenate(new_l, axis=1)
        acc_sc[...] = jnp.concatenate(new_acc, axis=1)

    if causality:
        # Skip fully-masked (above-diagonal) k tiles entirely.
        pl.when(kv * bk <= qi * bq + (bq - 1))(_compute)
    else:
        _compute()

    @pl.when(kv == pl.num_programs(2) - 1)
    def _():
        inv_l = pl.reciprocal(l_sc[...], approx=True)                # (bq, H) on EUP
        acc = acc_sc[...]
        attn = jnp.concatenate(
            [acc[:, h * d:(h + 1) * d] * inv_l[:, h:h + 1] for h in range(H)],
            axis=1)                                                  # (bq, C) lane-dense
        attn = attn * qmask_ref[0]                                   # query mask, (bq, 1)
        # TODO(synk): output_dropout is identity at the default dropout_rate=0; not implemented.
        x = attn + res_ref[0]                                        # residual
        mean = jnp.mean(x, axis=-1, keepdims=True)
        diff = x - mean
        # reference uses torch.Tensor.std (unbiased, N-1) and adds eps to std
        var = jnp.sum(diff * diff, axis=-1, keepdims=True) / jnp.float32(C - 1)
        std = jnp.sqrt(var)
        y = gamma_ref[...] * diff / (std + epsilon) + beta_ref[...]
        o_ref[0] = y.astype(o_ref.dtype)


def fused_attention(Q, K, V, key_mask, query_mask, residual, gamma, beta,
                    *, num_heads, causality, epsilon,
                    block_q=256, block_k=512):
    N, Tq, C = Q.shape
    Tk = K.shape[1]
    bq = Tq if Tq <= block_q else block_q
    bk = Tk if Tk <= block_k else block_k
    grid = (N, pl.cdiv(Tq, bq), pl.cdiv(Tk, bk))

    if causality:
        # Clamp ki to the last tile this q tile can see: fully-masked tiles reuse the
        # previous block index (no new DMA); the kernel skips their compute via pl.when.
        def kv_idx(n, qi, ki):
            return (n, jnp.minimum(ki, (qi * bq + bq - 1) // bk), 0)

        def kmask_idx(n, qi, ki):
            return (n, 0, jnp.minimum(ki, (qi * bq + bq - 1) // bk))
    else:
        def kv_idx(n, qi, ki):
            return (n, ki, 0)

        def kmask_idx(n, qi, ki):
            return (n, 0, ki)

    kernel = functools.partial(_mha_fused_kernel, num_heads=num_heads,
                               causality=causality, epsilon=epsilon, seq_k=Tk)

    return pl.pallas_call(
        kernel,
        out_shape=jax.ShapeDtypeStruct((N, Tq, C), jnp.float32),
        grid=grid,
        in_specs=[
            pl.BlockSpec((1, bq, C), lambda n, qi, ki: (n, qi, 0)),   # Q (bf16)
            pl.BlockSpec((1, bk, C), kv_idx),                         # K (bf16)
            pl.BlockSpec((1, bk, C), kv_idx),                         # V (bf16)
            pl.BlockSpec((1, 1, bk), kmask_idx),                      # key mask   (N,1,Tk)
            pl.BlockSpec((1, bq, 1), lambda n, qi, ki: (n, qi, 0)),   # query mask (N,Tq,1)
            pl.BlockSpec((1, bq, C), lambda n, qi, ki: (n, qi, 0)),   # residual (queries)
            pl.BlockSpec((1, C), lambda n, qi, ki: (0, 0)),           # gamma (1, C)
            pl.BlockSpec((1, C), lambda n, qi, ki: (0, 0)),           # beta  (1, C)
        ],
        out_specs=pl.BlockSpec((1, bq, C), lambda n, qi, ki: (n, qi, 0)),
        scratch_shapes=[
            pltpu.VMEM((bq, num_heads), jnp.float32),   # running max per head
            pltpu.VMEM((bq, num_heads), jnp.float32),   # running denom per head
            pltpu.VMEM((bq, C), jnp.float32),           # output accumulator (head slabs)
        ],
        compiler_params=pltpu.CompilerParams(
            dimension_semantics=("parallel", "parallel", "arbitrary"),
            vmem_limit_bytes=_VMEM_LIMIT),
    )(Q, K, V, key_mask, query_mask, residual,
      gamma.reshape(1, C), beta.reshape(1, C))


# ------------------------------- Forward wrapper ------------------------------
def multihead_attention_forward(queries, keys, values, params,
                                num_heads=8, causality=False, epsilon=1e-8):
    N, Tq, C = queries.shape
    Tk = keys.shape[1]
    assert C % num_heads == 0
    d = C // num_heads
    scale = 1.0 / math.sqrt(d)

    # Fold 1/sqrt(d) into the Q projection (ReLU commutes with positive scaling);
    # the attention kernel never rescales Q.
    Wq = params['Wq'] * scale
    bq_ = params['bq'] * scale

    # projections (Linear + ReLU) — Pallas kernel A, row-tiled, bf16 outputs
    Q = linear_relu(queries.reshape(N * Tq, C), Wq, bq_).reshape(N, Tq, C)
    K = linear_relu(keys.reshape(N * Tk, C), params['Wk'], params['bk']).reshape(N, Tk, C)
    V = linear_relu(values.reshape(N * Tk, C), params['Wv'], params['bv']).reshape(N, Tk, C)

    # padding masks (cheap reductions; kept as JAX glue), shaped for lane-friendly blocks
    key_mask = jnp.sign(jnp.abs(jnp.sum(keys, axis=-1))).reshape(N, 1, Tk)
    query_mask = jnp.sign(jnp.abs(jnp.sum(queries, axis=-1))).reshape(N, Tq, 1)

    # fused attention + query mask + residual + layer norm — Pallas kernel B
    return fused_attention(Q, K, V, key_mask, query_mask, queries,
                           params['gamma'], params['beta'],
                           num_heads=num_heads, causality=causality, epsilon=epsilon)


# ---------------------------- Pure-JAX reference ------------------------------
def _reference(queries, keys, values, params, num_heads, causality, epsilon):
    N, Tq, C = queries.shape
    Tk = keys.shape[1]
    d = C // num_heads
    relu = lambda x: jnp.maximum(x, 0.0)
    Q = relu(queries @ params['Wq'] + params['bq'])
    K = relu(keys @ params['Wk'] + params['bk'])
    V = relu(values @ params['Wv'] + params['bv'])
    split = lambda X: jnp.concatenate(jnp.split(X, num_heads, axis=2), axis=0)  # (H*N,T,d)
    Q_, K_, V_ = split(Q), split(K), split(V)
    s = jnp.einsum('btd,bkd->btk', Q_, K_) / math.sqrt(d)
    neg = jnp.float32(-2.0 ** 32 + 1)
    key_masks = jnp.sign(jnp.abs(jnp.sum(keys, axis=-1)))            # (N, Tk)
    key_masks = jnp.tile(key_masks, (num_heads, 1))[:, None, :]      # (H*N, 1, Tk)
    s = jnp.where(key_masks == 0.0, neg, s)
    if causality:
        tril = jnp.tril(jnp.ones((Tq, Tk), jnp.float32))
        s = jnp.where(tril[None] == 0.0, neg, s)
    p = jax.nn.softmax(s, axis=-1)
    query_masks = jnp.sign(jnp.abs(jnp.sum(queries, axis=-1)))       # (N, Tq)
    query_masks = jnp.tile(query_masks, (num_heads, 1))[:, :, None]
    p = p * query_masks
    out = jnp.einsum('btk,bkd->btd', p, V_)
    out = jnp.concatenate(jnp.split(out, num_heads, axis=0), axis=2)  # (N, Tq, C)
    out = out + queries
    mean = out.mean(-1, keepdims=True)
    std = jnp.sqrt(jnp.sum((out - mean) ** 2, -1, keepdims=True) / (C - 1))
    return params['gamma'] * (out - mean) / (std + epsilon) + params['beta']


# --------------------------------- Main / demo ---------------------------------
def init_params(key, num_units):
    k = 1.0 / math.sqrt(num_units)
    ks = jax.random.split(key, 6)
    mk = lambda kk, shape: jax.random.uniform(kk, shape, jnp.float32, -k, k)
    return {
        'Wq': mk(ks[0], (num_units, num_units)), 'bq': mk(ks[1], (num_units,)),
        'Wk': mk(ks[2], (num_units, num_units)), 'bk': mk(ks[3], (num_units,)),
        'Wv': mk(ks[4], (num_units, num_units)), 'bv': mk(ks[5], (num_units,)),
        'gamma': jnp.ones((num_units,), jnp.float32),
        'beta': jnp.zeros((num_units,), jnp.float32),
    }


if __name__ == "__main__":
    num_units = 32
    num_heads = 8
    N, Tq, Tk = 2, 8, 8

    root = jax.random.PRNGKey(0)
    kq, kk, kv, kp = jax.random.split(root, 4)
    queries = jax.random.normal(kq, (N, Tq, num_units), jnp.float32)
    keys = jax.random.normal(kk, (N, Tk, num_units), jnp.float32)
    values = jax.random.normal(kv, (N, Tk, num_units), jnp.float32)
    params = init_params(kp, num_units)

    out = multihead_attention_forward(queries, keys, values, params,
                                      num_heads=num_heads, causality=False)
    out = jax.block_until_ready(out)
    assert out.shape == (N, Tq, num_units)
    assert bool(jnp.all(jnp.isfinite(out)))

    ref = _reference(queries, keys, values, params, num_heads, False, 1e-8)
    max_err = float(jnp.max(jnp.abs(out - ref)))
    assert max_err < 1e-1, f"mismatch vs reference: max_err={max_err}"

    print("KERNEL_OK")
</pallas_src>

<mosaic_0001>
module attributes {stable_mosaic.version = 11 : i64} {
  func.func @_linear_relu_kernel(%arg0: i32, %arg1: memref<16x32xf32, #tpu.memory_space<vmem>>, %arg2: memref<32x32xf32, #tpu.memory_space<vmem>>, %arg3: memref<1x32xf32, #tpu.memory_space<vmem>>, %arg4: memref<16x32xbf16, #tpu.memory_space<vmem>>) attributes {dimension_semantics = [#tpu.dimension_semantics<parallel>], iteration_bounds = array<i64: 1>, scalar_prefetch = 0 : i64, scratch_operands = 0 : i64, tpu.core_type = #tpu.core_type<tc>, window_params = [{transform_indices = @transform_0, window_bounds = array<i64: 16, 32>}, {pipeline_mode = #tpu.pipeline_mode<synchronous>, transform_indices = @transform_1, window_bounds = array<i64: 32, 32>}, {pipeline_mode = #tpu.pipeline_mode<synchronous>, transform_indices = @transform_2, window_bounds = array<i64: 1, 32>}, {transform_indices = @transform_3, window_bounds = array<i64: 16, 32>}]} {
    %c0 = arith.constant 0 : index
    %c0_0 = arith.constant 0 : index
    %0 = vector.load %arg1[%c0, %c0_0] : memref<16x32xf32, #tpu.memory_space<vmem>>, vector<16x32xf32>
    %1 = arith.truncf %0 : vector<16x32xf32> to vector<16x32xbf16>
    %c0_1 = arith.constant 0 : index
    %c0_2 = arith.constant 0 : index
    %2 = vector.load %arg2[%c0_1, %c0_2] : memref<32x32xf32, #tpu.memory_space<vmem>>, vector<32x32xf32>
    %3 = arith.truncf %2 : vector<32x32xf32> to vector<32x32xbf16>
    %cst = arith.constant dense<0.000000e+00> : vector<16x32xf32>
    %4 = tpu.matmul %1, %3, %cst {dimension_numbers = #tpu.dot_dimension_numbers<[1], [0], [0], [1], [0, 0, 1, 1], [], []>} : vector<16x32xbf16>, vector<32x32xbf16>, vector<16x32xf32> -> vector<16x32xf32>
    %c0_3 = arith.constant 0 : index
    %c0_4 = arith.constant 0 : index
    %5 = vector.load %arg3[%c0_3, %c0_4] : memref<1x32xf32, #tpu.memory_space<vmem>>, vector<1x32xf32>
    %6 = vector.broadcast %5 : vector<1x32xf32> to vector<16x32xf32>
    %7 = arith.addf %4, %6 : vector<16x32xf32>
    %cst_5 = arith.constant 0.000000e+00 : f32
    %8 = vector.broadcast %cst_5 : f32 to vector<16x32xf32>
    %9 = arith.maximumf %7, %8 : vector<16x32xf32>
    %10 = arith.truncf %9 : vector<16x32xf32> to vector<16x32xbf16>
    %c0_6 = arith.constant 0 : index
    %c0_7 = arith.constant 0 : index
    %11 = vector.load %arg4[%c0_6, %c0_7] : memref<16x32xbf16, #tpu.memory_space<vmem>>, vector<16x32xbf16>
    tpu.vector_store %arg4[%c0_6, %c0_7], %10 {strides = array<i32>} : memref<16x32xbf16, #tpu.memory_space<vmem>>, vector<16x32xbf16>,
    return
  }
  func.func @transform_0(%arg0: i32) -> (i32, i32) {
    %c0_i32 = arith.constant 0 : i32
    %c0_i32_0 = arith.constant 0 : i32
    return %arg0, %c0_i32 : i32, i32
  }
  func.func @transform_1(%arg0: i32) -> (i32, i32) {
    %c0_i32 = arith.constant 0 : i32
    %c0_i32_0 = arith.constant 0 : i32
    %c0_i32_1 = arith.constant 0 : i32
    return %c0_i32, %c0_i32_0 : i32, i32
  }
  func.func @transform_2(%arg0: i32) -> (i32, i32) {
    %c0_i32 = arith.constant 0 : i32
    %c0_i32_0 = arith.constant 0 : i32
    %c0_i32_1 = arith.constant 0 : i32
    return %c0_i32, %c0_i32_0 : i32, i32
  }
  func.func @transform_3(%arg0: i32) -> (i32, i32) {
    %c0_i32 = arith.constant 0 : i32
    %c0_i32_0 = arith.constant 0 : i32
    return %arg0, %c0_i32 : i32, i32
  }
}

</mosaic_0001>

<bundles_post_ra>
// kernel: tpu_custom_call.1
= control target key start
LH: loop header
LB: loop body
LE: loop exit
PB: predicated region body
PF: predicated region fallthrough
CT: control target
= control target key end

     0   :  { %8 = vsyncpa [#allocation3], 0  ;;  %s232_s0 = inlined_call_operand.hbm [shape: f32[16,32], index: 0, kind: input, shape index: {}]   ;;  %s233_s1 = inlined_call_operand.hbm [shape: f32[32,32], index: 1, kind: input, shape index: {}]   ;;  %s234_s2 = inlined_call_operand.vmem [shape: f32[1,32], index: 2, kind: input, shape index: {}]   ;;  %s235_s3 = inlined_call_operand.hbm [shape: bf16[16,32], index: 3, kind: output, shape index: {}]  }
   0x1   :  { %9 = vsyncpa [#allocation6], 0 }
   0x2   :  { %10 = vsyncpa [#allocation4], 0  ;;  %s15_s14 = sshll.u32 %s232_s0, 4  ;;  %s193_s15 = smov [#allocation2]   ;;  %s16_s14 = int_to_ptr.hbm [resolvable:$true] %s15_s14 }
   0x3   :  { %s17_s16 = sshll.u32 %s193_s15, 4  ;;  %s28_s19 = sshll.u32 %s233_s1, 4  ;;  %s18_s16 = int_to_ptr.vmem [resolvable:$true] %s17_s16  ;;  %s29_s19 = int_to_ptr.hbm [resolvable:$true] %s28_s19 }
   0x4   :  { %s194_s20 = smov 128   ;;  %s195_s21 = smov 8  }
   0x5   :  { %23 = dma.hbm_to_vmem [thread:$0]  %s16_s14, 256, %s18_s16, [#allocation3], %s194_s20, %s194_s20, %s195_s21  }
   0x6   :  { %s196_s22 = smov [#allocation5]  }
   0x7   :  { %s30_s23 = sshll.u32 %s196_s22, 4  ;;  %s31_s23 = int_to_ptr.vmem [resolvable:$true] %s30_s23 }
   0x8   :  { %36 = dma.hbm_to_vmem [thread:$0]  %s29_s19, 512, %s31_s23, [#allocation6], %s194_s20, %s194_s20, %s195_s21  }
   0x9   :  { %187 = dma.done.wait [#allocation3], 256  }
   0xa   :  { %188 = vsyncadd [#allocation3], 4294967040 }
   0xb   :  { %189 = dma.done.wait [#allocation6], 512  }
   0xc   :  { %190 = vsyncadd [#allocation6], 4294966784  ;;  %v53_v0 = vld [vmem:[#allocation5 + $0x10] sm:$0xff]  ;;  %v54_v1 = vld [vmem:[#allocation5 + $0x18] sm:$0xff]  ;;  %vm61_vm0 = vcmask 261120   ;;  %vm83_vm1 = vcmask 257024  }
   0xd   :  { %v51_v2 = vld [vmem:[#allocation5] sm:$0xff]  ;;  %v56_v3 = vpack.c.bf16 %v54_v1, %v53_v0  ;;  %v52_v4 = vld [vmem:[#allocation5 + $0x8] sm:$0xff]  ;;  %v48_v6 = vld [vmem:[#allocation2] sm:$0xff]  ;;  %s197_s24 = smov [#allocation7]   ;;  %s92_s28 = sshll.u32 %s235_s3, 4  ;;  %s93_s28 = int_to_ptr.hbm [resolvable:$true] %s92_s28 }
   0xe   :  { %v55_v5 = vpack.c.bf16 %v52_v4, %v51_v2  ;;  %v49_v7 = vld [vmem:[#allocation2 + $0x8] sm:$0xff]  ;;  %v114_v9 = vld [vmem:[%s234_s2] ss:$0 sm:$0xff]  ;;  %s90_s25 = sshll.u32 %s197_s24, 4  ;;  %s198_s2 = smov 64   ;;  %s91_s25 = int_to_ptr.vmem [resolvable:$true] %s90_s25 }
   0xf   :  { %71 = vmatpush.bf16.msra.mxu0 %v56_v3  ;;  %v50_v8 = vpack.c.bf16 %v49_v7, %v48_v6  ;;  %s199_s29 = smov 4  }
  0x13   :  { %72 = vmatpush.bf16.msra.mxu0 %v55_v5 }
  0x16   :  { %106 = vmatmul.msk.bf16.vlgmr.msra.gmra.mxu0 %vm61_vm0, %v50_v8 }
  0x93   :  { %v74_v10 = vpop.f32.mrf.mxu0 }
  0x94   :  { %v75_v11 = vadd.f32 %v114_v9, %v74_v10 }
  0x96   :  { %v79_v12 = vmax.f32 %v75_v11, 0.0 }
  0x98   :  { %v81_v13 = vpack.c.bf16 %v79_v12, %v79_v12 }
  0x9a   :  { %84 = vst.msk [vmem:[#allocation7] sm:$0xf] %vm83_vm1, %v81_v13 }
  0x9b   :  { %v76_v14 = vpop.f32.mrf.mxu0 }
  0x9c   :  { %v77_v15 = vadd.f32 %v114_v9, %v76_v14 }
  0x9e   :  { %v80_v16 = vmax.f32 %v77_v15, 0.0 }
  0xa0   :  { %v82_v17 = vpack.c.bf16 %v80_v16, %v80_v16 }
  0xa2   :  { %85 = vst.msk [vmem:[#allocation7 + $0x4] sm:$0xf] %vm83_vm1, %v82_v17 }
  0xa3   :  { %98 = dma.vmem_to_hbm [thread:$0]  %s91_s25, 128, %s93_s28, [#allocation4], %s198_s2, %s198_s2, %s199_s29  }
  0xa4   :  { %191 = dma.done.wait [#allocation4], 128  }
  0xa5   :  { %192 = vsyncadd [#allocation4], 4294967168 }
  0xa6   :  { %103 = vsyncpa [#allocation3], 1 }
  0xa7   :  { %104 = vsyncpa [#allocation6], 1 }
  0xa8   :  { %105 = vsyncpa [#allocation4], 1 }

</bundles_post_ra>
